<compile_context>
chip_gen: v7x
topology: tpu7x:2x2x1
jax: 0.10.0
libtpu: 0.0.40
codegen_flags: <defaults>
</compile_context>

<pallas_src>
import math

import jax
import jax.numpy as jnp
import numpy as np
from jax.experimental import pallas as pl
from jax.experimental.pallas import tpu as pltpu


# ----------------------------------------------------------------------------- regions
def _rmac_regions(H, W, levels):
    """Reproduce torch's unfold-based region enumeration (order matters for cat)."""
    regions = []
    for l in range(1, levels + 1):
        wl = int(2 * min(H, W) / (l + 1))
        hl = wl
        stride_h = math.floor((H - hl) / l) + 1
        stride_w = math.floor((W - wl) / l) + 1
        n1 = (H - hl) // stride_h + 1
        n2 = (W - wl) // stride_w + 1
        for r1 in range(n1):          # row-major over (n1, n2), levels in order
            for r2 in range(n2):
                regions.append((r1 * stride_h, r2 * stride_w, hl, wl))
    return regions


def _build_pool_matrix(H, W, levels):
    """(R, H*W) exact 0/1 membership matrix + per-region 1/(hl*wl) scales."""
    regions = _rmac_regions(H, W, levels)
    R = len(regions)
    P = np.zeros((R, H * W), dtype=np.float32)
    inv_area = np.zeros((R,), dtype=np.float32)
    for r, (y0, x0, hl, wl) in enumerate(regions):
        inv_area[r] = 1.0 / float(hl * wl)
        for dy in range(hl):
            row = (y0 + dy) * W
            P[r, row + x0: row + x0 + wl] = 1.0
    return P, inv_area, R


# ----------------------------------------------------------------------------- kernel
def _rmac_kernel(x_ref, pool_ref, inv_ref, o_ref):
    # x_ref:    (TB, CT, HW) f32   -- natural (channels-first) layout tile
    # pool_ref: (R,  HW)     bf16  -- exact 0/1 region membership
    # inv_ref:  (R,  1)      f32   -- per-region 1/(hl*wl)
    # o_ref:    (TB, R,  C)  f32   -- resident across the C-tile grid axis
    tb, ct, _ = x_ref.shape
    R, C = o_ref.shape[1], o_ref.shape[2]
    n_ct = C // ct
    ci = pl.program_id(1)

    pool = pool_ref[...]                                       # (R, HW) bf16
    scale = jnp.broadcast_to(inv_ref[...], (R, ct))            # hoisted broadcast (f32)

    # Contract HW on both operands: (R, HW) x (CT, HW)^T -> (R, CT); channels end up
    # on the lane axis so output stores stay dense and no wrapper transpose is needed.
    dims = (((1,), (1,)), ((), ()))
    for b in range(tb):                                        # small static unroll
        xb = x_ref[b].astype(jnp.bfloat16)                     # VPU cast, hidden under DMA
        feat = jax.lax.dot_general(pool, xb, dims,
                                   preferred_element_type=jnp.float32)   # (R, CT)
        feat = feat * scale                                    # exact f32 region average
        if n_ct == 1:
            o_ref[b] = feat
        else:
            off = pl.multiple_of(ci * ct, ct)                  # lane-aligned C offset
            o_ref[b, :, pl.ds(off, ct)] = feat

    # Finalize: on the last C tile the resident output block holds the full
    # unnormalized (R, C) features; L2-normalize per batch row in place.
    # NOTE: relies on the output block staying resident across the ("arbitrary")
    # C-tile axis and on an f32 accumulator (1e-24 clamp == max(||v||, 1e-12)**2).
    @pl.when(ci == n_ct - 1)
    def _():
        for b in range(tb):
            fb = o_ref[b]                                      # (R, C) f32 from VMEM
            ssq = jnp.sum(fb * fb)
            inv = jax.lax.rsqrt(jnp.maximum(ssq, 1e-24))       # EUP rsqrt
            o_ref[b] = fb * inv


# ----------------------------------------------------------------------------- tuning
def _vmem_capacity_bytes():
    try:
        info = pltpu.get_tpu_info()
        cap = getattr(info, "vmem_capacity_bytes", None)
        if cap:
            return int(cap)
    except Exception:
        pass
    return 64 << 20                       # conservative default (v7x per-TC VMEM)


def _num_tensorcores(vmem_cap):
    try:
        kind = jax.local_devices()[0].device_kind.lower()
        if "v7" in kind:
            return 2
    except Exception:
        pass
    # v7x: 64 MiB VMEM / 2 TCs per chip; v5e / v6e: 128 MiB / 1 TC.
    return 2 if vmem_cap <= (64 << 20) else 1


def _pick_tiles(B, C, HW, vmem_cap, num_cores):
    x_budget = max(vmem_cap // 3, 4 << 20)           # budget for double-buffered x block

    def x_block_bytes(tb, ct):
        return 2 * tb * ct * HW * 4                  # f32 input, 2-deep buffering

    # Channel tile: keep full C when it fits; otherwise the largest divisor of C that
    # is a multiple of 128 (preferred) or 8 and fits the budget (clamps CT, not just TB).
    ct = C
    if x_block_bytes(1, C) > x_budget:
        cands = sorted({d for d in range(128, C, 128) if C % d == 0}, reverse=True)
        if not cands:
            cands = sorted({d for d in range(8, C, 8) if C % d == 0}, reverse=True)
        for cand in cands:
            if x_block_bytes(1, cand) <= x_budget:
                ct = cand
                break
        else:
            if cands:
                ct = cands[-1]
    # TODO(synk): on v7x with very large H*W, tile HW as a second reduction axis
    # (accumulating into the resident (TB,R,C) block) instead of shrinking CT below 512.

    # Batch tile: biggest divisor of B whose block fits; on 2-TC parts keep the number
    # of parallel grid steps a multiple of the core count so both cores stay busy.
    tb = 1
    for cand in range(min(B, 8), 0, -1):
        if B % cand:
            continue
        if x_block_bytes(cand, ct) > x_budget:
            continue
        if num_cores > 1 and cand != 1 and (B // cand) % num_cores != 0:
            continue
        tb = cand
        break
    return tb, ct


# ----------------------------------------------------------------------------- wrapper
def rmac_forward(x, levels=3):
    """x: (B, C, H, W) float32 -> (B, C*R) float32 (matches torch RMAC.forward)."""
    B, C, H, W = x.shape
    HW = H * W
    pool_np, inv_np, R = _build_pool_matrix(H, W, levels)
    pool = jnp.asarray(pool_np, dtype=jnp.bfloat16)            # exact 0/1 in bf16
    inv_area = jnp.asarray(inv_np, dtype=jnp.float32).reshape(R, 1)

    # Natural layout: (B, C, H, W) -> (B, C, HW) is a free reshape (no extra HBM pass).
    x_flat = x.reshape(B, C, HW).astype(jnp.float32)

    vmem_cap = _vmem_capacity_bytes()
    num_cores = _num_tensorcores(vmem_cap)
    TB, CT = _pick_tiles(B, C, HW, vmem_cap, num_cores)
    n_b, n_ct = B // TB, C // CT

    est = (2 * TB * CT * HW * 4          # double-buffered x block
           + 2 * R * HW * 2              # pool matrix (bf16)
           + 2 * R * 4                   # per-region scales
           + 2 * TB * R * C * 4)         # resident output block
    vmem_limit = int(min(max(est + (8 << 20), 32 << 20), (vmem_cap * 3) // 4))

    cost = pl.CostEstimate(
        flops=2 * B * R * HW * C,
        bytes_accessed=B * C * HW * 4 + R * HW * 2 + B * R * C * 4,
        transcendentals=0,
    )

    feat = pl.pallas_call(
        _rmac_kernel,
        out_shape=jax.ShapeDtypeStruct((B, R, C), jnp.float32),
        grid_spec=pltpu.PrefetchScalarGridSpec(
            num_scalar_prefetch=0,
            grid=(n_b, n_ct),
            in_specs=[
                pl.BlockSpec((TB, CT, HW), lambda b, c: (b, c, 0)),
                pl.BlockSpec((R, HW), lambda b, c: (0, 0)),
                pl.BlockSpec((R, 1), lambda b, c: (0, 0)),
            ],
            out_specs=pl.BlockSpec((TB, R, C), lambda b, c: (b, 0, 0)),
        ),
        compiler_params=pltpu.CompilerParams(
            dimension_semantics=("parallel", "arbitrary"),
            vmem_limit_bytes=vmem_limit,
        ),
        cost_estimate=cost,
    )(x_flat, pool, inv_area)

    # torch.cat(feats, dim=1) ordering is out[b, r*C + c] -- already (B, R, C).
    return feat.reshape(B, R * C)


# ----------------------------------------------------------------------------- reference
def _rmac_reference(x, levels=3):
    """Pure-JAX f32 reference (matches the torch module's forward)."""
    B, C, H, W = x.shape
    feats = []
    for (y0, x0, hl, wl) in _rmac_regions(H, W, levels):
        patch = x[:, :, y0:y0 + hl, x0:x0 + wl]
        feats.append(jnp.mean(patch, axis=(2, 3)))             # (B, C)
    f = jnp.concatenate(feats, axis=1)                         # (B, C*R)
    n = jnp.sqrt(jnp.sum(f * f, axis=1, keepdims=True))
    return f / jnp.maximum(n, 1e-12)


if __name__ == "__main__":
    key = jax.random.PRNGKey(0)
    B, C, H, W = 2, 4, 16, 16
    x = jax.random.normal(key, (B, C, H, W), dtype=jnp.float32)

    out = jax.block_until_ready(rmac_forward(x, levels=3))
    ref = _rmac_reference(x, levels=3)

    assert out.shape == ref.shape, (out.shape, ref.shape)
    # Only remaining low-precision step is the in-kernel bf16 cast of x (exact 0/1
    # pool weights, f32 scaling/accumulation) -> tighter tolerance than before.
    np.testing.assert_allclose(np.asarray(out), np.asarray(ref), rtol=5e-3, atol=5e-3)

    print("KERNEL_OK")
</pallas_src>

<mosaic_0001>
module attributes {stable_mosaic.version = 11 : i64} {
  func.func @_rmac_kernel(%arg0: i32, %arg1: i32, %arg2: memref<1x4x256xf32, #tpu.memory_space<vmem>>, %arg3: memref<14x256xbf16, #tpu.memory_space<vmem>>, %arg4: memref<14x1xf32, #tpu.memory_space<vmem>>, %arg5: memref<1x14x4xf32, #tpu.memory_space<vmem>>) attributes {dimension_semantics = [#tpu.dimension_semantics<parallel>, #tpu.dimension_semantics<arbitrary>], iteration_bounds = array<i64: 2, 1>, scalar_prefetch = 0 : i64, scratch_operands = 0 : i64, tpu.core_type = #tpu.core_type<tc>, window_params = [{transform_indices = @transform_0, window_bounds = array<i64: 1, 4, 256>}, {pipeline_mode = #tpu.pipeline_mode<synchronous>, transform_indices = @transform_1, window_bounds = array<i64: 14, 256>}, {pipeline_mode = #tpu.pipeline_mode<synchronous>, transform_indices = @transform_2, window_bounds = array<i64: 14, 1>}, {transform_indices = @transform_3, window_bounds = array<i64: 1, 14, 4>}]} {
    %c0 = arith.constant 0 : index
    %c0_0 = arith.constant 0 : index
    %0 = vector.load %arg3[%c0, %c0_0] : memref<14x256xbf16, #tpu.memory_space<vmem>>, vector<14x256xbf16>
    %c0_1 = arith.constant 0 : index
    %c0_2 = arith.constant 0 : index
    %1 = vector.load %arg4[%c0_1, %c0_2] : memref<14x1xf32, #tpu.memory_space<vmem>>, vector<14x1xf32>
    %2 = vector.shape_cast %1 : vector<14x1xf32> to vector<14x1xf32>
    %3 = vector.broadcast %2 : vector<14x1xf32> to vector<14x4xf32>
    %c0_3 = arith.constant 0 : index
    %c0_4 = arith.constant 0 : index
    %c0_5 = arith.constant 0 : index
    %4 = vector.load %arg2[%c0_3, %c0_4, %c0_5] : memref<1x4x256xf32, #tpu.memory_space<vmem>>, vector<1x4x256xf32>
    %5 = vector.shape_cast %4 : vector<1x4x256xf32> to vector<4x256xf32>
    %6 = arith.truncf %5 : vector<4x256xf32> to vector<4x256xbf16>
    %cst = arith.constant dense<0.000000e+00> : vector<14x4xf32>
    %7 = tpu.matmul %0, %6, %cst {dimension_numbers = #tpu.dot_dimension_numbers<[1], [1], [0], [0], [0, 0, 1, 0], [], []>} : vector<14x256xbf16>, vector<4x256xbf16>, vector<14x4xf32> -> vector<14x4xf32>
    %8 = arith.mulf %7, %3 : vector<14x4xf32>
    %c0_6 = arith.constant 0 : index
    %c0_7 = arith.constant 0 : index
    %c0_8 = arith.constant 0 : index
    %9 = vector.load %arg5[%c0_6, %c0_7, %c0_8] : memref<1x14x4xf32, #tpu.memory_space<vmem>>, vector<1x14x4xf32>
    %10 = vector.shape_cast %9 : vector<1x14x4xf32> to vector<14x4xf32>
    %11 = vector.shape_cast %8 : vector<14x4xf32> to vector<1x14x4xf32>
    tpu.vector_store %arg5[%c0_6, %c0_7, %c0_8], %11 {strides = array<i32>} : memref<1x14x4xf32, #tpu.memory_space<vmem>>, vector<1x14x4xf32>,
    %c0_i32 = arith.constant 0 : i32
    %12 = arith.cmpi eq, %arg1, %c0_i32 : i32
    %13 = arith.extui %12 : i1 to i32
    %c0_i32_9 = arith.constant 0 : i32
    %14 = arith.cmpi ne, %13, %c0_i32_9 : i32
    scf.if %14 {
      %c0_10 = arith.constant 0 : index
      %c0_11 = arith.constant 0 : index
      %c0_12 = arith.constant 0 : index
      %15 = vector.load %arg5[%c0_10, %c0_11, %c0_12] : memref<1x14x4xf32, #tpu.memory_space<vmem>>, vector<1x14x4xf32>
      %16 = vector.shape_cast %15 : vector<1x14x4xf32> to vector<14x4xf32>
      %17 = arith.mulf %16, %16 : vector<14x4xf32>
      %18 = vector.shape_cast %17 : vector<14x4xf32> to vector<1x14x4xf32>
      %cst_13 = arith.constant dense<0.000000e+00> : vector<1xf32>
      %19 = vector.multi_reduction <add>, %18, %cst_13 [1, 2] : vector<1x14x4xf32> to vector<1xf32>
      %20 = vector.shape_cast %19 : vector<1xf32> to vector<1x1x1xf32>
      %21 = vector.extract %20[0, 0, 0] : f32 from vector<1x1x1xf32>
      %cst_14 = arith.constant 1.000000e-24 : f32
      %22 = arith.maximumf %21, %cst_14 : f32
      %23 = math.rsqrt %22 : f32
      %24 = vector.broadcast %23 : f32 to vector<14x4xf32>
      %25 = arith.mulf %16, %24 : vector<14x4xf32>
      %c0_15 = arith.constant 0 : index
      %c0_16 = arith.constant 0 : index
      %c0_17 = arith.constant 0 : index
      %26 = vector.load %arg5[%c0_15, %c0_16, %c0_17] : memref<1x14x4xf32, #tpu.memory_space<vmem>>, vector<1x14x4xf32>
      %27 = vector.shape_cast %26 : vector<1x14x4xf32> to vector<14x4xf32>
      %28 = vector.shape_cast %25 : vector<14x4xf32> to vector<1x14x4xf32>
      tpu.vector_store %arg5[%c0_15, %c0_16, %c0_17], %28 {strides = array<i32>} : memref<1x14x4xf32, #tpu.memory_space<vmem>>, vector<1x14x4xf32>,
    } else {
    }
    return
  }
  func.func @transform_0(%arg0: i32, %arg1: i32) -> (i32, i32, i32) {
    %c0_i32 = arith.constant 0 : i32
    %c0_i32_0 = arith.constant 0 : i32
    return %arg0, %arg1, %c0_i32 : i32, i32, i32
  }
  func.func @transform_1(%arg0: i32, %arg1: i32) -> (i32, i32) {
    %c0_i32 = arith.constant 0 : i32
    %c0_i32_0 = arith.constant 0 : i32
    %c0_i32_1 = arith.constant 0 : i32
    return %c0_i32, %c0_i32_0 : i32, i32
  }
  func.func @transform_2(%arg0: i32, %arg1: i32) -> (i32, i32) {
    %c0_i32 = arith.constant 0 : i32
    %c0_i32_0 = arith.constant 0 : i32
    %c0_i32_1 = arith.constant 0 : i32
    return %c0_i32, %c0_i32_0 : i32, i32
  }
  func.func @transform_3(%arg0: i32, %arg1: i32) -> (i32, i32, i32) {
    %c0_i32 = arith.constant 0 : i32
    %c0_i32_0 = arith.constant 0 : i32
    %c0_i32_1 = arith.constant 0 : i32
    return %arg0, %c0_i32, %c0_i32_0 : i32, i32, i32
  }
}

</mosaic_0001>

<bundles_post_ra>
// kernel: tpu_custom_call.1
= control target key start
LH: loop header
LB: loop body
LE: loop exit
PB: predicated region body
PF: predicated region fallthrough
CT: control target
= control target key end

     0   :  { %8 = vsyncpa [#allocation3], 0  ;;  %s552_s12 = smov 0   ;;  %s554_s13 = smov 0   ;;  %s648_s0 = inlined_call_operand.vmem [shape: f32[2,4,256], index: 0, kind: input, shape index: {}]   ;;  %s649_s1 = inlined_call_operand.hbm [shape: bf16[14,256], index: 1, kind: input, shape index: {}]   ;;  %s650_s2 = inlined_call_operand.vmem [shape: f32[14,1], index: 2, kind: input, shape index: {}]   ;;  %s651_s3 = inlined_call_operand.vmem [shape: f32[2,14,4], index: 3, kind: output, shape index: {}]  }
   0x1   :  { %s556_s14 = smov 0  }
   0x2 LB: > { %s404_s15 = sadd.s32 4294967295, %s525_s14   ;;  %s26_s16 = sadd.s32 1, %s521_s13  ;;  %s525_s14 = sphi %s556_s14, %s14_s14   ;;  %s521_s13 = sphi %s554_s13, %s661_s13   ;;  %s517_s12 = sphi %s552_s12, %s660_s12  }
   0x3   : > { %p28_p0 = scmp.ge.s32.totalorder %s26_s16, 2  ;;  %p406_p1 = scmp.ge.s32.totalorder %s525_s14, 1 }
   0x4   : > { %p127_p2 = scmp.lt.s32.totalorder %s525_s14, 3  ;;  %p577_p4 = scmp.eq.s32.totalorder %s404_s15, 0 }
   0x5   : > { %s663_s16 = smov (%p28_p0, %s26_s16), 0  ;;  %s527_s19 = smov [#allocation2]  }
   0x6   : > { %p573_p3 = pnand %p406_p1, %p127_p2  ;;  %s139_s20 = sshll.u32 %s527_s19, 4  ;;  %s140_s20 = int_to_ptr.vmem [resolvable:$true] %s139_s20 }
   0x7   : > { %s656_s18 = scalar_select %p577_p4, 1, 0 }
   0x8   : > { %s655_s17 = scalar_select %p573_p3, 1, 0 }
   0x9   : > { %p429_p5 = pneg %p573_p3  ;;  %s471_s24 = scalar_lea.hbm %s649_s1, 256 }
   0xa   : > { %p472_p7 = scmp.ne.s32.totalorder %s649_s1, %s471_s24  ;;  %p478_p11 = scmp.lt.u32.totalorder %s471_s24, %s649_s1 }
   0xb   : > { %p585_p6 = pnand %p577_p4, %p429_p5 }
   0xd   : > { %p473_p8 = pneg %p585_p6 }
   0xf   : > { %p474_p9 = pnand %p473_p8, %p472_p7 }
  0x11   : > { %p475_p10 = pneg %p474_p9 }
  0x13   : > { %p480_p12 = pnand %p478_p11, %p475_p10 }
  0x15   : > { %483 = shalt.err (!%p480_p12)
}
  0x16   : > { %s484_s29 = scalar_lea.vmem %s140_s20, 256  ;;  %p492_p2 = scmp.lt.s32.totalorder %s140_s20, %s140_s20 }
  0x17   : > { %p485_p13 = scmp.ne.s32.totalorder %s140_s20, %s484_s29  ;;  %p493_p5 = scmp.lt.s32.totalorder %s484_s29, %s484_s29 }
  0x19   : > { %p487_p0 = pnand %p485_p13, %p473_p8  ;;  %p494_p4 = por %p493_p5, %p492_p2 }
  0x1b   : > { %p488_p1 = pneg %p487_p0 }
  0x1d   : > { %p495_p3 = pnand %p494_p4, %p488_p1 }
  0x1f   : > { %498 = shalt.err (!%p495_p3)
}
  0x20   : > { %s528_s30 = smov 128   ;;  %s529_s4 = smov 8  }
  0x21   : > { %432 = dma.hbm_to_vmem [thread:$0]  (!%p585_p6), %s649_s1, 256, %s140_s20, [#allocation3], %s528_s30, %s528_s30, %s529_s4  }
  0x22   : > { %p658_p7 = scmp.ne.s32.totalorder %s655_s17, 0 }
  0x23   : > { %p659_p9 = scmp.ne.s32.totalorder (!%p658_p7), %s656_s18, 0 }
  0x24   : > { %170 = sbr.rel (%p658_p7) target bundleno = 563 (0x233), region = 32 }
  0x2b   : > { %512 = dma.done.wait (%p659_p9), [#allocation3], 256  }
  0x2c   : > { %514 = vsyncadd (%p659_p9), [#allocation3], 4294967040  ;;  %p198_p3 = scmp.lt.s32.totalorder %s517_s12, 1  ;;  %v530_v0 = vmov 0   ;;  %v215_v5 = vld [vmem:[%s650_s2] sm:$0xff]  ;;  %vm286_vm0 = vcmask 31744  }
  0x2d   : > { %464 = vset.pattern.permute.xlu0 %v530_v0  ;;  %v468_v3 = vld [vmem:[#allocation2 + $0x4] ss:$8 sps:$4 sm:$0x7f]   ;;  %v466_v8 = vld [vmem:[#allocation2] ss:$8 sps:$4 sm:$0x7f]  }
  0x2e   : > { %s665_s12 = smov (!%p198_p3, %s517_s12), 1  ;;  %275 = vmatprep.mubr.bf16.mxu0 %v468_v3  ;;  %219 = vperm.xlu0 %464, %v215_v5   ;;  %v216_v7 = vld [vmem:[%s650_s2 + $0x8] sm:$0x3f]  ;;  %vm288_vm1 = vcmask 29696   ;;  %s531_s23 = smov 1e-24  }
  0x2f   : > { %s419_s7 = sshll.u32 %s665_s12, 3  ;;  %s420_s19 = sshll.u32 %s665_s12, 4 }
  0x30   : > { %s206_s10 = scalar_lea.vmem %s648_s0, %s419_s7  ;;  %s625_s22 = scalar_lea.vmem %s651_s3, %s420_s19 }
  0x31   : > { %v227_v1 = vld [vmem:[%s206_s10] sm:$0xff] }
  0x32   : > { %v229_v2 = vcombine.high %v227_v1, %v227_v1  ;;  %v231_v4 = vpack.c.bf16 %v227_v1, %v227_v1  ;;  %224 = vperm.xlu0 %464, %v216_v7  }
  0x34   : > { %v232_v6 = vpack.c.bf16 %v229_v2, %v229_v2 }
  0x36   : > { %243 = vmatprep.subr.bf16.mxu0 %v232_v6 }
  0x37   : > { %244 = vmatpush1.bf16.xpose.msra.mxu0 %v231_v4 }
  0x3e   : > { %276 = vmatmul.mubr.bf16.vlgmr.msra.gmra.mrb[0].mxu0 %v466_v8 }
  0xad   : > { %v220_v9 = vpop.permute.xlu0 %219 }
  0xb1   : > { %v225_v13 = vpop.permute.xlu0 %224 }
 0x111   : > { %v277_v10 = vpop.f32.mrb[0].mxu0 }
 0x112   : > { %v284_v11 = vmul.f32 %v277_v10, %v220_v9  ;;  %v279_v12 = vpop.f32.mrb[1].mxu0 }
 0x113   : > { %v280_v14 = vpop.f32.mrb[2].mxu0 }
 0x114   : > { %v285_v15 = vmul.f32 %v280_v14, %v225_v13  ;;  %v282_v16 = vpop.f32.mrb[3].mxu0  ;;  %287 = vst.msk [vmem:[%s625_s22] sm:$0xff] %vm286_vm0, %v284_v11 }
 0x116   : > { %289 = vst.msk [vmem:[%s625_s22 + $0x8] sm:$0x3f] %vm288_vm1, %v285_v15 }
 0x11b   : > { %v294_v17 = vld [vmem:[%s625_s22] sm:$0xff] }
 0x11c   : > { %v296_v18 = vmul.f32 %v294_v17, %v294_v17 }
 0x11d   : > { %v295_v19 = vld [vmem:[%s625_s22 + $0x8] sm:$0x3f] }
 0x11e   : > { %v297_v20 = vmul.f32 %v295_v19, %v295_v19  ;;  %v298_v21 = vsel %vm286_vm0, %v296_v18, 0.0 }
 0x120   : > { %v299_v22 = vsel %vm288_vm1, %v297_v20, 0.0 }
 0x121   : > { %v300_v23 = vadd.f32 %v299_v22, %v298_v21 }
 0x123   : > { %301 = vadd.xlane.f32.xlu1 %v300_v23 }
 0x1b0   : > { %v302_v24 = vpop.xlane.xlu1 %301 }
 0x1b1   : > { %v303_v25 = vrot.slane %v302_v24, 4 }
 0x1b3   : > { %v304_v26 = vadd.f32 %v303_v25, %v302_v24 }
 0x1b5   : > { %v305_v27 = vrot.slane %v304_v26, 2 }
 0x1b7   : > { %v306_v28 = vadd.f32 %v305_v27, %v304_v26 }
 0x1b9   : > { %v307_v29 = vrot.slane %v306_v28, 1 }
 0x1bb   : > { %v308_v30 = vadd.f32 %v307_v29, %v306_v28 }
 0x1bd   : > { %421 = vpush %v308_v30 }
 0x1ee   : > { %s422_s12 = spop %421 }
 0x1ef   : > { %s310_s24 = smax.f32 %s531_s23, %s422_s12 }
 0x1f0   : > { %v311_v31 = vstv %s310_s24 }
 0x1f1   : > { %469 = vrsqrt.f32 %v311_v31 }
 0x1fb   : > { %v470_v32 = vpop.eup %469 }
 0x1fc   : > { %423 = vpush %v470_v32 }
 0x22d   : > { %s424_s25 = spop %423 }
 0x22e   : > { %v314_v33 = vstv %s424_s25 }
 0x22f   : > { %v315_v34 = vmul.f32 %v314_v33, %v294_v17  ;;  %v316_v35 = vmul.f32 %v314_v33, %v295_v19 }
 0x231   : > { %317 = vst.msk [vmem:[%s625_s22] sm:$0xff] %vm286_vm0, %v315_v34 }
 0x232   : > { %318 = vst.msk [vmem:[%s625_s22 + $0x8] sm:$0x3f] %vm288_vm1, %v316_v35 }
 0x233 PF: > { %s14_s14 = sadd.s32 1, %s525_s14   ;;  %s660_s12 = smov %s521_s13 }
 0x234   : > { %p11_p4 = scmp.ge.s32.totalorder %s14_s14, 4   ;;  %s661_s13 = smov %s663_s16 }
 0x236   :  { %13 = sbr.rel (!%p11_p4) target bundleno = 2 (0x2), region = 71 }
 0x23d   :  { %340 = vsyncpa [#allocation3], 1 }
 0x23e   :  { %342 = vsyncpa [#allocation3 + $0x1], 1 }

</bundles_post_ra>
